<compile_context>
chip_gen: v5e
topology: v5e:2x2
jax: 0.10.0
libtpu: 0.0.40
codegen_flags: <defaults>
</compile_context>

<pallas_src>
import math
from functools import partial

import jax
import jax.numpy as jnp
from jax.experimental import pallas as pl
from jax.experimental.pallas import tpu as pltpu


# --------------------------------------------------------------------------
# Kernels
# --------------------------------------------------------------------------
def _softmax_attend(q_ref, k_ref, v_ref, o_ref, w_ref, keep, compute_dtype):
    """Core SDPA math on one (HBLK, TQ, D) query tile against (HBLK, S, D) K/V.

    keep: optional boolean, broadcastable to (HBLK, TQ, S); False => masked.
    """
    d_k = q_ref.shape[-1]
    scale = 1.0 / math.sqrt(d_k)
    q = q_ref[...]
    k = k_ref[...]
    v = v_ref[...]
    if compute_dtype is not None:          # optional bf16 MXU path (off by default)
        q = q.astype(compute_dtype)
        k = k.astype(compute_dtype)
        v = v.astype(compute_dtype)
    # Fold 1/sqrt(d_k) into Q: scales S*D elements instead of the S*S scores.
    q = q * jnp.asarray(scale, dtype=q.dtype)
    # Batched QK^T with K consumed in its native [S, D] layout (no .T / XLU pass).
    scores = jax.lax.dot_general(
        q, k,
        dimension_numbers=(((2,), (2,)), ((0,), (0,))),
        preferred_element_type=jnp.float32)
    if keep is not None:
        # masked_fill semantics: replace (not add) so fully-masked rows match torch.
        scores = jnp.where(keep, scores, jnp.float32(-1e9))
    m = jnp.max(scores, axis=-1, keepdims=True)
    p = jnp.exp(scores - m)
    denom = jnp.sum(p, axis=-1, keepdims=True)
    w = p * pl.reciprocal(denom)           # exact recip: keeps 1e-4 parity with ref
    w_ref[...] = w.astype(w_ref.dtype)
    o = jax.lax.dot_general(
        w.astype(v.dtype), v,
        dimension_numbers=(((2,), (1,)), ((0,), (0,))),
        preferred_element_type=jnp.float32)
    o_ref[...] = o.astype(o_ref.dtype)


def _attn_kernel(compute_dtype, q_ref, k_ref, v_ref, o_ref, w_ref):
    _softmax_attend(q_ref, k_ref, v_ref, o_ref, w_ref, None, compute_dtype)


def _attn_kernel_resident_mask(compute_dtype, q_ref, k_ref, v_ref, m_ref,
                               o_ref, w_ref):
    # m_ref: (1, S, S) f32 keep-mask, fully VMEM-resident (constant block index,
    # single-buffered). Slice the rows belonging to this query tile in-kernel.
    tq = q_ref.shape[1]
    start = pl.multiple_of(pl.program_id(1) * tq, tq)
    keep = m_ref[:, pl.ds(start, tq), :] != 0.0    # (1, TQ, S), broadcasts over heads
    _softmax_attend(q_ref, k_ref, v_ref, o_ref, w_ref, keep, compute_dtype)


def _attn_kernel_streamed_mask(compute_dtype, q_ref, k_ref, v_ref, m_ref,
                               o_ref, w_ref):
    # m_ref: (1 or HBLK, TQ, S) int8 mask streamed per grid step (0 => masked).
    keep = m_ref[...] != 0
    _softmax_attend(q_ref, k_ref, v_ref, o_ref, w_ref, keep, compute_dtype)


# --------------------------------------------------------------------------
# Tiling / VMEM sizing
# --------------------------------------------------------------------------
def _vmem_capacity_bytes():
    """Per-TensorCore VMEM capacity (generation-aware), with safe fallback."""
    try:
        return int(pltpu.get_tpu_info().vmem_capacity_bytes)
    except Exception:
        return 64 * 1024 * 1024  # conservative: v7x has 64 MiB per TensorCore


def _block_vmem_bytes(hblk, tq, S, D, itemsize, w_itemsize, mask_mode):
    """One consistent VMEM estimate used for both tile choice and vmem_limit."""
    # Double-buffered streams (BlockSpec pipeline): q, o, w (+ streamed mask).
    dbl = hblk * tq * D * itemsize            # q tile
    dbl += hblk * tq * D * itemsize           # o tile
    dbl += hblk * tq * S * w_itemsize         # w (attention weights) tile
    if mask_mode == "stream_per_head":
        dbl += hblk * tq * S                  # int8 mask tile
    elif mask_mode == "stream_shared":
        dbl += tq * S                         # int8 mask tile (shared over heads)
    # Single-buffered (pl.Buffered(1)): K, V (+ resident shared f32 keep-mask).
    single = 2 * hblk * S * D * itemsize
    if mask_mode == "resident":
        single += S * S * 4
    # f32 scores / exp(p) intermediates materialized by the compiler.
    interm = 2 * hblk * tq * S * 4
    return 2 * dbl + single + interm


def _choose_tiles(BH, S, D, itemsize, w_itemsize, mask_mode, budget):
    """Pick (HBLK, TQ) maximizing the writeback slab size within the VMEM budget."""
    # Query-tile candidates: largest multiple of 128 dividing S (up to 512);
    # fall back to full S for small / odd lengths.
    tq_cands = [t for t in (512, 256, 128) if S % t == 0 and S >= t]
    if not tq_cands:
        tq_cands = [S]
    best = None
    for tq in tq_cands:                       # largest TQ first (fewest grid steps)
        for hblk in range(min(BH, 16), 0, -1):
            if BH % hblk != 0:
                continue
            # Keep >= 2 head-blocks so both v7x TensorCores get work
            # (no-op on single-core v5e/v6e, and harmless when BH == 1).
            if hblk > 1 and BH >= 2 and BH // hblk < 2:
                continue
            need = _block_vmem_bytes(hblk, tq, S, D, itemsize, w_itemsize, mask_mode)
            if need <= budget:
                score = hblk * tq             # size of the dominant w writeback slab
                if best is None or score > best[0]:
                    best = (score, hblk, tq, need)
                break                         # largest feasible hblk for this TQ
    if best is None:                          # nothing fits: minimal tiles, may spill
        tq = tq_cands[-1]
        need = _block_vmem_bytes(1, tq, S, D, itemsize, w_itemsize, mask_mode)
        best = (0, 1, tq, need)
    return best[1], best[2], best[3]


# --------------------------------------------------------------------------
# Wrapper
# --------------------------------------------------------------------------
def scaled_dot_product_attention(Q, K, V, mask=None, *,
                                 weights_dtype=None, compute_dtype=None):
    """Q, K, V: [B, H, S, D]; mask broadcastable to [B, H, S, S] (0 => -1e9).

    Returns (output [B, H, S, D], attn_weights [B, H, S, S]).

    weights_dtype: dtype of the returned attention weights (default: Q.dtype).
      Setting jnp.bfloat16 roughly halves the dominant HBM writeback stream,
      but changes the interface dtype — off by default.
    compute_dtype: optional MXU compute dtype (e.g. jnp.bfloat16) with f32
      accumulation. Off by default to keep exact f32 parity with the reference.
    """
    B, H, S, D = Q.shape
    BH = B * H
    qf = Q.reshape(BH, S, D)
    kf = K.reshape(BH, S, D)
    vf = V.reshape(BH, S, D)

    weights_dtype = Q.dtype if weights_dtype is None else jnp.dtype(weights_dtype)
    itemsize = jnp.dtype(Q.dtype).itemsize
    w_itemsize = jnp.dtype(weights_dtype).itemsize

    # ---- mask preparation -------------------------------------------------
    mask_mode = None
    mf = None
    if mask is not None:
        m4 = jnp.asarray(mask)
        m4 = m4.reshape((1,) * (4 - m4.ndim) + tuple(m4.shape))
        shared = (m4.shape[0] == 1 and m4.shape[1] == 1)
        if shared and S * S * 4 <= (8 << 20):
            # One f32 keep-mask block, fully VMEM-resident: a single DMA total,
            # and a plain f32 compare+select per tile (no int8 relayout).
            mask_mode = "resident"
            mf = (m4[0, 0] != 0).astype(jnp.float32).reshape(1, S, S)
        elif shared:
            mask_mode = "stream_shared"       # too big to pin: stream int8 tiles
            mf = (m4[0, 0] != 0).astype(jnp.int8).reshape(1, S, S)
        else:
            mask_mode = "stream_per_head"     # per-(b,h): int8 keeps HBM traffic low
            mf = jnp.broadcast_to((m4 != 0).astype(jnp.int8),
                                  (B, H, S, S)).reshape(BH, S, S)

    # ---- generation-aware tiling & VMEM limit ------------------------------
    capacity = _vmem_capacity_bytes()
    budget = capacity // 2                    # headroom for Mosaic scratch etc.
    HBLK, TQ, need = _choose_tiles(BH, S, D, itemsize, w_itemsize, mask_mode, budget)
    n_qt = S // TQ
    grid = (BH // HBLK, n_qt)

    vmem_limit = int(min(max(need + (4 << 20), 32 << 20), int(capacity * 0.6)))
    vmem_limit = int(min(max(vmem_limit, need + (2 << 20)), capacity))

    # ---- BlockSpecs ---------------------------------------------------------
    q_spec = pl.BlockSpec((HBLK, TQ, D), lambda i, j: (i, j, 0))
    # K/V block index is constant across the query-tile axis: single-buffer them
    # (one exposed DMA per head-block change, amortized over n_qt steps) to free
    # VMEM for larger TQ / HBLK — important on v7x's 64 MiB per TensorCore.
    kv_spec = pl.BlockSpec((HBLK, S, D), lambda i, j: (i, 0, 0),
                           pipeline_mode=pl.Buffered(1))
    o_spec = pl.BlockSpec((HBLK, TQ, D), lambda i, j: (i, j, 0))
    w_spec = pl.BlockSpec((HBLK, TQ, S), lambda i, j: (i, j, 0))

    out_shapes = (
        jax.ShapeDtypeStruct((BH, S, D), Q.dtype),
        jax.ShapeDtypeStruct((BH, S, S), weights_dtype),
    )

    compiler_params = pltpu.CompilerParams(
        # Shard only the head-block axis across TensorCores (v7x megacore):
        # keeps K/V residency per core and balances head-blocks across cores.
        dimension_semantics=("parallel", "arbitrary"),
        vmem_limit_bytes=vmem_limit,
    )

    if mask_mode is None:
        kernel = partial(_attn_kernel, compute_dtype)
        in_specs = [q_spec, kv_spec, kv_spec]
        args = (qf, kf, vf)
    elif mask_mode == "resident":
        kernel = partial(_attn_kernel_resident_mask, compute_dtype)
        m_spec = pl.BlockSpec((1, S, S), lambda i, j: (0, 0, 0),
                              pipeline_mode=pl.Buffered(1))
        in_specs = [q_spec, kv_spec, kv_spec, m_spec]
        args = (qf, kf, vf, mf)
    else:
        kernel = partial(_attn_kernel_streamed_mask, compute_dtype)
        if mask_mode == "stream_shared":
            m_spec = pl.BlockSpec((1, TQ, S), lambda i, j: (0, j, 0))
        else:
            m_spec = pl.BlockSpec((HBLK, TQ, S), lambda i, j: (i, j, 0))
        in_specs = [q_spec, kv_spec, kv_spec, m_spec]
        args = (qf, kf, vf, mf)

    out, attn = pl.pallas_call(
        kernel,
        out_shape=out_shapes,
        grid=grid,
        in_specs=in_specs,
        out_specs=(o_spec, w_spec),
        compiler_params=compiler_params,
    )(*args)

    return out.reshape(B, H, S, D), attn.reshape(B, H, S, S)


# --------------------------------------------------------------------------
# Reference + self-test
# --------------------------------------------------------------------------
def _reference(Q, K, V, mask=None):
    d_k = Q.shape[-1]
    scores = jnp.einsum("bhqd,bhkd->bhqk", Q, K) / math.sqrt(d_k)
    if mask is not None:
        scores = jnp.where(mask == 0, -1e9, scores)
    w = jax.nn.softmax(scores, axis=-1)
    out = jnp.einsum("bhqk,bhkd->bhqd", w, V)
    return out, w


if __name__ == "__main__":
    B, H, S, D = 2, 2, 8, 32
    key = jax.random.PRNGKey(0)
    kq, kk, kv, km = jax.random.split(key, 4)
    Q = jax.random.normal(kq, (B, H, S, D), dtype=jnp.float32)
    K = jax.random.normal(kk, (B, H, S, D), dtype=jnp.float32)
    V = jax.random.normal(kv, (B, H, S, D), dtype=jnp.float32)

    # unmasked
    out, attn = scaled_dot_product_attention(Q, K, V)
    jax.block_until_ready(out)
    jax.block_until_ready(attn)
    ref_out, ref_attn = _reference(Q, K, V)
    assert jnp.allclose(out, ref_out, atol=1e-4, rtol=1e-4)
    assert jnp.allclose(attn, ref_attn, atol=1e-4, rtol=1e-4)

    # shared causal mask: one (S, S) keep-mask kept fully VMEM-resident
    causal = jnp.tril(jnp.ones((S, S), dtype=jnp.int32))[None, None]
    out_m, attn_m = scaled_dot_product_attention(Q, K, V, mask=causal)
    jax.block_until_ready(out_m)
    ref_out_m, ref_attn_m = _reference(Q, K, V, mask=causal)
    assert jnp.allclose(out_m, ref_out_m, atol=1e-4, rtol=1e-4)
    assert jnp.allclose(attn_m, ref_attn_m, atol=1e-4, rtol=1e-4)

    # per-batch mask (exercises the streamed int8 mask path)
    rnd = jax.random.bernoulli(km, 0.7, (B, 1, S, S)).astype(jnp.int32)
    rnd = jnp.maximum(rnd, jnp.eye(S, dtype=jnp.int32)[None, None])
    out_b, attn_b = scaled_dot_product_attention(Q, K, V, mask=rnd)
    jax.block_until_ready(out_b)
    ref_out_b, ref_attn_b = _reference(Q, K, V, mask=rnd)
    assert jnp.allclose(out_b, ref_out_b, atol=1e-4, rtol=1e-4)
    assert jnp.allclose(attn_b, ref_attn_b, atol=1e-4, rtol=1e-4)

    print("KERNEL_OK")
</pallas_src>

<mosaic_0001>
module attributes {stable_mosaic.version = 11 : i64} {
  func.func @_attn_kernel(%arg0: i32, %arg1: i32, %arg2: memref<2x8x32xf32, #tpu.memory_space<vmem>>, %arg3: memref<2x8x32xf32, #tpu.memory_space<vmem>>, %arg4: memref<2x8x32xf32, #tpu.memory_space<vmem>>, %arg5: memref<2x8x32xf32, #tpu.memory_space<vmem>>, %arg6: memref<2x8x8xf32, #tpu.memory_space<vmem>>) attributes {dimension_semantics = [#tpu.dimension_semantics<parallel>, #tpu.dimension_semantics<arbitrary>], iteration_bounds = array<i64: 2, 1>, scalar_prefetch = 0 : i64, scratch_operands = 0 : i64, tpu.core_type = #tpu.core_type<tc>, window_params = [{transform_indices = @transform_0, window_bounds = array<i64: 2, 8, 32>}, {pipeline_mode = #tpu.pipeline_mode<synchronous>, transform_indices = @transform_1, window_bounds = array<i64: 2, 8, 32>}, {pipeline_mode = #tpu.pipeline_mode<synchronous>, transform_indices = @transform_2, window_bounds = array<i64: 2, 8, 32>}, {transform_indices = @transform_3, window_bounds = array<i64: 2, 8, 32>}, {transform_indices = @transform_4, window_bounds = array<i64: 2, 8, 8>}]} {
    %c0 = arith.constant 0 : index
    %c0_0 = arith.constant 0 : index
    %c0_1 = arith.constant 0 : index
    %0 = vector.load %arg2[%c0, %c0_0, %c0_1] : memref<2x8x32xf32, #tpu.memory_space<vmem>>, vector<2x8x32xf32>
    %c0_2 = arith.constant 0 : index
    %c0_3 = arith.constant 0 : index
    %c0_4 = arith.constant 0 : index
    %1 = vector.load %arg3[%c0_2, %c0_3, %c0_4] : memref<2x8x32xf32, #tpu.memory_space<vmem>>, vector<2x8x32xf32>
    %c0_5 = arith.constant 0 : index
    %c0_6 = arith.constant 0 : index
    %c0_7 = arith.constant 0 : index
    %2 = vector.load %arg4[%c0_5, %c0_6, %c0_7] : memref<2x8x32xf32, #tpu.memory_space<vmem>>, vector<2x8x32xf32>
    %cst = arith.constant 0.176776692 : f32
    %3 = vector.broadcast %cst : f32 to vector<2x8x32xf32>
    %4 = arith.mulf %0, %3 : vector<2x8x32xf32>
    %cst_8 = arith.constant dense<0.000000e+00> : vector<2x8x8xf32>
    %5 = tpu.matmul %4, %1, %cst_8 {dimension_numbers = #tpu.dot_dimension_numbers<[2], [2], [1], [1], [0, 0, 0, 1, 1, 1], [0], [0]>} : vector<2x8x32xf32>, vector<2x8x32xf32>, vector<2x8x8xf32> -> vector<2x8x8xf32>
    %cst_9 = arith.constant dense<0xFF800000> : vector<2x8xf32>
    %6 = vector.multi_reduction <maximumf>, %5, %cst_9 [2] : vector<2x8x8xf32> to vector<2x8xf32>
    %7 = vector.shape_cast %6 : vector<2x8xf32> to vector<2x8x1xf32>
    %8 = vector.broadcast %7 : vector<2x8x1xf32> to vector<2x8x8xf32>
    %9 = arith.subf %5, %8 : vector<2x8x8xf32>
    %10 = math.exp %9 : vector<2x8x8xf32>
    %cst_10 = arith.constant dense<0.000000e+00> : vector<2x8xf32>
    %11 = vector.multi_reduction <add>, %10, %cst_10 [2] : vector<2x8x8xf32> to vector<2x8xf32>
    %12 = vector.shape_cast %11 : vector<2x8xf32> to vector<2x8x1xf32>
    %13 = tpu.reciprocal %12 : vector<2x8x1xf32> -> vector<2x8x1xf32>
    %14 = vector.broadcast %13 : vector<2x8x1xf32> to vector<2x8x8xf32>
    %15 = arith.mulf %10, %14 : vector<2x8x8xf32>
    %c0_11 = arith.constant 0 : index
    %c0_12 = arith.constant 0 : index
    %c0_13 = arith.constant 0 : index
    %16 = vector.load %arg6[%c0_11, %c0_12, %c0_13] : memref<2x8x8xf32, #tpu.memory_space<vmem>>, vector<2x8x8xf32>
    tpu.vector_store %arg6[%c0_11, %c0_12, %c0_13], %15 {strides = array<i32>} : memref<2x8x8xf32, #tpu.memory_space<vmem>>, vector<2x8x8xf32>,
    %cst_14 = arith.constant dense<0.000000e+00> : vector<2x8x32xf32>
    %17 = tpu.matmul %15, %2, %cst_14 {dimension_numbers = #tpu.dot_dimension_numbers<[2], [1], [1], [2], [0, 0, 0, 1, 1, 2], [0], [0]>} : vector<2x8x8xf32>, vector<2x8x32xf32>, vector<2x8x32xf32> -> vector<2x8x32xf32>
    %c0_15 = arith.constant 0 : index
    %c0_16 = arith.constant 0 : index
    %c0_17 = arith.constant 0 : index
    %18 = vector.load %arg5[%c0_15, %c0_16, %c0_17] : memref<2x8x32xf32, #tpu.memory_space<vmem>>, vector<2x8x32xf32>
    tpu.vector_store %arg5[%c0_15, %c0_16, %c0_17], %17 {strides = array<i32>} : memref<2x8x32xf32, #tpu.memory_space<vmem>>, vector<2x8x32xf32>,
    return
  }
  func.func @transform_0(%arg0: i32, %arg1: i32) -> (i32, i32, i32) {
    %c0_i32 = arith.constant 0 : i32
    %c0_i32_0 = arith.constant 0 : i32
    return %arg0, %arg1, %c0_i32 : i32, i32, i32
  }
  func.func @transform_1(%arg0: i32, %arg1: i32) -> (i32, i32, i32) {
    %c0_i32 = arith.constant 0 : i32
    %c0_i32_0 = arith.constant 0 : i32
    %c0_i32_1 = arith.constant 0 : i32
    return %arg0, %c0_i32, %c0_i32_0 : i32, i32, i32
  }
  func.func @transform_2(%arg0: i32, %arg1: i32) -> (i32, i32, i32) {
    %c0_i32 = arith.constant 0 : i32
    %c0_i32_0 = arith.constant 0 : i32
    %c0_i32_1 = arith.constant 0 : i32
    return %arg0, %c0_i32, %c0_i32_0 : i32, i32, i32
  }
  func.func @transform_3(%arg0: i32, %arg1: i32) -> (i32, i32, i32) {
    %c0_i32 = arith.constant 0 : i32
    %c0_i32_0 = arith.constant 0 : i32
    return %arg0, %arg1, %c0_i32 : i32, i32, i32
  }
  func.func @transform_4(%arg0: i32, %arg1: i32) -> (i32, i32, i32) {
    %c0_i32 = arith.constant 0 : i32
    %c0_i32_0 = arith.constant 0 : i32
    return %arg0, %arg1, %c0_i32 : i32, i32, i32
  }
}

</mosaic_0001>

<bundles_post_ra>
// kernel: tpu_custom_call.1
= control target key start
LH: loop header
LB: loop body
LE: loop exit
PB: predicated region body
PF: predicated region fallthrough
CT: control target
= control target key end

     0   :  { %10 = vsyncpa [#allocation3], 0  ;;  %s1237_s0 = inlined_call_operand.hbm [shape: f32[4,8,32], index: 0, kind: input, shape index: {}]   ;;  %s1238_s1 = inlined_call_operand.hbm [shape: f32[4,8,32], index: 1, kind: input, shape index: {}]   ;;  %s1239_s2 = inlined_call_operand.hbm [shape: f32[4,8,32], index: 2, kind: input, shape index: {}]   ;;  %s1240_s3 = inlined_call_operand.hbm [shape: f32[4,8,32], index: 3, kind: output, shape index: {0}]   ;;  %s1241_s4 = inlined_call_operand.hbm [shape: f32[4,8,8], index: 4, kind: output, shape index: {1}]  }
   0x1   :  { %12 = vsyncpa [#allocation3 + $0x1], 0 }
   0x2   :  { %13 = vsyncpa [#allocation6], 0 }
   0x3   :  { %14 = vsyncpa [#allocation4], 0 }
   0x4   :  { %16 = vsyncpa [#allocation4 + $0x1], 0 }
   0x5   :  { %17 = vsyncpa [#allocation10], 0 }
   0x6   :  { %19 = vsyncpa [#allocation10 + $0x1], 0  ;;  %s1012_s15 = smov 0   ;;  %s1014_s16 = smov 0  }
   0x7   :  { %s1016_s17 = smov 0   ;;  %s1018_s18 = smov 0  }
   0x8   :  { %s1020_s19 = smov 0   ;;  %s1022_s20 = smov 0  }
   0x9 LB: > { %s645_s21 = sadd.s32 4294967295, %s979_s20   ;;  %s646_s22 = sadd.s32 4294967294, %s979_s20   ;;  %s979_s20 = sphi %s1022_s20, %s25_s20   ;;  %s975_s19 = sphi %s1020_s19, %s1251_s19   ;;  %s971_s18 = sphi %s1018_s18, %s1250_s18   ;;  %s967_s17 = sphi %s1016_s17, %s1249_s17   ;;  %s963_s16 = sphi %s1014_s16, %s1248_s16   ;;  %s959_s15 = sphi %s1012_s15, %s1247_s15  }
   0xa   : > { %p59_p0 = scmp.ne.s32.totalorder %s963_s16, %s959_s15  ;;  %p60_p1 = scmp.eq.s32.totalorder %s645_s21, 0 }
   0xb   : > { %p143_p2 = scmp.eq.s32.totalorder %s646_s22, 1  ;;  %p647_p4 = scmp.ge.s32.totalorder %s979_s20, 1 }
   0xc   : > { %p1046_p3 = por %p60_p1, %p59_p0  ;;  %p178_p6 = scmp.lt.s32.totalorder %s979_s20, 3 }
   0xd   : > { %p1051_p5 = por %p143_p2, %p59_p0  ;;  %s1056_s25 = sshll.u32 %s971_s18, 4 }
   0xe   : > { %p1058_p7 = pnand %p647_p4, %p178_p6  ;;  %s191_s29 = scalar_lea.hbm %s1238_s1, %s1056_s25 }
   0xf   : > { %s1066_s30 = sshll.u32 %s191_s29, 4  ;;  %s981_s5 = smov [#allocation5]   ;;  %s193_s30 = int_to_ptr.hbm [resolvable:$true] %s1066_s30 }
  0x10   : > { %s194_s6 = sshll.u32 %s981_s5, 4  ;;  %p689_p8 = pneg %p1058_p7  ;;  %s195_s6 = int_to_ptr.vmem [resolvable:$true] %s194_s6 }
  0x11   : > { %s208_s10 = scalar_lea.hbm %s1239_s2, %s1056_s25  ;;  %p652_p10 = scmp.ge.s32.totalorder %s979_s20, 2 }
  0x12   : > { %p1073_p9 = pnand %p689_p8, %p1046_p3  ;;  %s1082_s11 = sshll.u32 %s208_s10, 4  ;;  %s210_s11 = int_to_ptr.hbm [resolvable:$true] %s1082_s11 }
  0x13   : > { %s771_s12 = sshra.s32 %s193_s30, 4  ;;  %s778_s22 = scalar_lea.hbm %s1238_s1, 32  ;;  %s772_s12 = int_to_ptr.hbm [resolvable:$true] %s771_s12 }
  0x14   : > { %s773_s13 = scalar_lea.hbm %s772_s12, 16  ;;  %p775_p12 = pneg %p1073_p9 }
  0x15   : > { %p774_p11 = scmp.ne.s32.totalorder %s772_s12, %s773_s13  ;;  %p779_p1 = scmp.lt.s32.totalorder %s772_s12, %s1238_s1 }
  0x16   : > { %p780_p2 = scmp.lt.s32.totalorder %s778_s22, %s773_s13 }
  0x17   : > { %p776_p13 = pnand %p775_p12, %p774_p11 }
  0x18   : > { %p781_p4 = por %p780_p2, %p779_p1 }
  0x19   : > { %p777_p0 = pneg %p776_p13 }
  0x1b   : > { %p782_p6 = pnand %p781_p4, %p777_p0 }
  0x1d   : > { %785 = shalt.err (!%p782_p6)
}
  0x1e   : > { %s982_s29 = smov 128   ;;  %s983_s5 = smov 8  }
  0x1f   : > { %692 = dma.hbm_to_vmem [thread:$0]  (!%p1073_p9), %s193_s30, 256, %s195_s6, [#allocation6], %s982_s29, %s982_s29, %s983_s5  }
  0x20   : > { %s984_s8 = smov [#allocation7]   ;;  %s801_s10 = sshra.s32 %s210_s11, 4  ;;  %s802_s10 = int_to_ptr.hbm [resolvable:$true] %s801_s10 }
  0x21   : > { %s211_s9 = sshll.u32 %s984_s8, 4  ;;  %s803_s12 = scalar_lea.hbm %s802_s10, 16  ;;  %s212_s9 = int_to_ptr.vmem [resolvable:$true] %s211_s9 }
  0x22   : > { %p804_p8 = scmp.ne.s32.totalorder %s802_s10, %s803_s12  ;;  %s808_s18 = scalar_lea.hbm %s1239_s2, 32 }
  0x23   : > { %p809_p0 = scmp.lt.s32.totalorder %s802_s10, %s1239_s2  ;;  %p810_p1 = scmp.lt.s32.totalorder %s808_s18, %s803_s12 }
  0x24   : > { %p806_p11 = pnand %p804_p8, %p775_p12 }
  0x25   : > { %p811_p2 = por %p810_p1, %p809_p0 }
  0x26   : > { %p807_p13 = pneg %p806_p11 }
  0x28   : > { %p812_p4 = pnand %p811_p2, %p807_p13 }
  0x2a   : > { %815 = shalt.err (!%p812_p4)
}
  0x2b   : > { %695 = dma.hbm_to_vmem [thread:$0]  (!%p1073_p9), %s210_s11, 256, %s212_s9, [#allocation6], %s982_s29, %s982_s29, %s983_s5  }
  0x2c   : > { %p137_p12 = scmp.eq.s32.totalorder %s645_s21, 1  ;;  %s37_s30 = sadd.s32 1, %s975_s19 }
  0x2d   : > { %p39_p6 = scmp.ge.s32.totalorder %s37_s30, 2  ;;  %s46_s6 = sadd.s32 1, %s967_s17 }
  0x2e   : > { %p53_p8 = scmp.ne.s32.totalorder %s967_s17, %s963_s16  ;;  %p54_p11 = scmp.eq.s32.totalorder %s979_s20, 0 }
  0x2f   : > { %s1253_s30 = smov (%p39_p6, %s37_s30), 0  ;;  %p707_p0 = scmp.lt.s32.totalorder %s979_s20, 2 }
  0x30   : > { %p1124_p13 = por %p137_p12, %p53_p8  ;;  %s41_s28 = ssub.s32 %s975_s19, %s1253_s30 }
  0x31   : > { %s225_s8 = sand.u32 1, %s967_s17   ;;  %p44_p9 = scmp.eq.s32.totalorder %s41_s28, 0 }
  0x32   : > { %p55_p1 = por %p54_p11, %p53_p8  ;;  %s653_s11 = sshll.u32 %s225_s8, 4 }
  0x33   : > { %s676_s21 = sshll.u32 %s975_s19, 4  ;;  %s229_s18 = scalar_lea.vmem [#allocation2], %s653_s11 }
  0x34   : > { %s1134_s9 = scalar_select %p44_p9, %s967_s17, %s46_s6  }
  0x35   : > { %s235_s13 = scalar_lea.hbm %s1237_s0, %s676_s21  ;;  %s238_s22 = sshll.u32 %s229_s18, 4  ;;  %s239_s22 = int_to_ptr.vmem [resolvable:$true] %s238_s22 }
  0x36   : > { %s236_s14 = sshll.u32 %s235_s13, 4  ;;  %p697_p2 = pnand %p707_p0, %p55_p1  ;;  %s237_s14 = int_to_ptr.hbm [resolvable:$true] %s236_s14 }
  0x37   : > { %s226_s27 = scalar_lea.sflag [#allocation3], %s225_s8  ;;  %250 = sbr.rel (%p1058_p7) target bundleno = 600 (0x258), region = 32 }
  0x38   : > { %699 = dma.hbm_to_vmem [thread:$0]  (!%p697_p2), %s237_s14, 256, %s239_s22, %s226_s27, %s982_s29, %s982_s29, %s983_s5  }
  0x39   : > { %s1147_s6 = sand.u32 (!%p1058_p7), 1, %s963_s16  }
  0x3a   : > { %s1150_s28 = sshll.u32 (!%p1058_p7), %s1147_s6, 4  ;;  %s253_s11 = scalar_lea.sflag (!%p1058_p7), [#allocation3], %s1147_s6 }
  0x3b   : > { %s256_s21 = scalar_lea.vmem (!%p1058_p7), [#allocation2], %s1150_s28 }
  0x3c   : > { %942 = dma.done.wait (%p1046_p3), %s253_s11, 256  }
  0x3d   : > { %944 = vsyncadd (%p1046_p3), %s253_s11, 4294967040 }
  0x3e   : > { %946 = dma.done.wait (%p1046_p3), [#allocation6], 512  }
  0x3f   : > { %948 = vsyncadd (%p1046_p3), [#allocation6], 4294966784  ;;  %vm310_vm0 = vcmask 261120   ;;  %v304_v0 = vld [vmem:[#allocation5] sm:$0xff]  ;;  %v305_v2 = vld [vmem:[#allocation5 + $0x8] sm:$0xff]  ;;  %vm363_vm1 = vcmask 64512   ;;  %s498_s8 = scalar_lea.hbm %s1241_s4, %s1056_s25 }
  0x40   : > { %v302_v1 = vld [vmem:[%s256_s21] sm:$0xff]  ;;  %660 = vmatpush.xpose.msk.msra.mxu0 %vm310_vm0, %v304_v0  ;;  %662 = vmatpush.xpose.msk.msra.mxu1 %vm310_vm0, %v305_v2  ;;  %v303_v4 = vld [vmem:[%s256_s21 + $0x8] sm:$0xff]  ;;  %s296_s23 = scalar_lea.vmem [#allocation9], %s1150_s28  ;;  %s501_s10 = sshll.u32 %s498_s8, 4  ;;  %s502_s10 = int_to_ptr.hbm [resolvable:$true] %s501_s10 }
  0x41   : > { %v308_v3 = vmul.f32 0.17677669, %v302_v1  ;;  %v309_v5 = vmul.f32 0.17677669, %v303_v4  ;;  %v306_v20 = vld [vmem:[#allocation7] sm:$0xff]  ;;  %v307_v21 = vld [vmem:[#allocation7 + $0x8] sm:$0xff] }
  0x42   : > { %432 = vmatpush.msra.mxu2 %v306_v20  ;;  %455 = vmatpush.msra.mxu3 %v307_v21  ;;  %s499_s26 = sshll.u32 %s296_s23, 4  ;;  %s468_s12 = scalar_lea.sflag [#allocation10], %s1147_s6  ;;  %s500_s26 = int_to_ptr.vmem [resolvable:$true] %s499_s26 }
  0x43   : > { %661 = vmatmul.msk.f32.vlgmr.msra.gmra.mxu0 %vm310_vm0, %v308_v3  ;;  %663 = vmatmul.msk.f32.vlgmr.msra.gmra.mxu1 %vm310_vm0, %v309_v5  ;;  %s875_s13 = sshra.s32 %s502_s10, 4  ;;  %s881_s27 = scalar_lea.hbm %s1241_s4, 32  ;;  %s876_s13 = int_to_ptr.hbm [resolvable:$true] %s875_s13 }
  0x44   : > { %s877_s14 = scalar_lea.hbm %s876_s13, 16  ;;  %p882_p12 = scmp.lt.s32.totalorder %s876_s13, %s1241_s4 }
  0x45   : > { %p878_p3 = scmp.ne.s32.totalorder %s876_s13, %s877_s14  ;;  %p883_p6 = scmp.lt.s32.totalorder %s881_s27, %s877_s14 }
  0x47   : > { %p879_p7 = pnand %p878_p3, %p1124_p13  ;;  %p884_p8 = por %p883_p6, %p882_p12 }
  0x49   : > { %p880_p4 = pneg %p879_p7 }
  0x4b   : > { %p885_p11 = pnand %p884_p8, %p880_p4 }
  0xc0   : > { %v334_v6 = vpop.f32.mrf.mxu0  ;;  %v360_v8 = vpop.f32.mrf.mxu1 }
  0xc1   : > { %v364_v7 = vsel %vm363_vm1, %v334_v6, -inf  ;;  %v367_v9 = vsel %vm363_vm1, %v360_v8, -inf }
  0xc2   : > { %365 = vmax.xlane.f32.xlu0 %v364_v7 }
  0xca   : > { %368 = vmax.xlane.f32.xlu0 %v367_v9 }
 0x135   : > { %v366_v10 = vpop.xlane.xlu0 %365 }
 0x136   : > { %v370_v11 = vsub.f32 %v334_v6, %v366_v10 }
 0x138   : > { %v372_v12 = vmul.f32 1.442695, %v370_v11 }
 0x13a   : > { %763 = vpow2.f32 %v372_v12 }
 0x13d   : > { %v369_v13 = vpop.xlane.xlu0 %368 }
 0x13e   : > { %v371_v14 = vsub.f32 %v360_v8, %v369_v13 }
 0x140   : > { %v764_v15 = vpop.eup %763  ;;  %v374_v16 = vmul.f32 1.442695, %v371_v14 }
 0x141   : > { %v376_v17 = vsel %vm363_vm1, %v764_v15, 0.0 }
 0x142   : > { %765 = vpow2.f32 %v374_v16  ;;  %377 = vadd.xlane.f32.xlu1 %v376_v17 }
 0x148   : > { %v766_v18 = vpop.eup %765 }
 0x149   : > { %v379_v19 = vsel %vm363_vm1, %v766_v18, 0.0 }
 0x14a   : > { %380 = vadd.xlane.f32.xlu1 %v379_v19 }
 0x1b5   : > { %v378_v22 = vpop.xlane.xlu1 %377 }
 0x1b6   : > { %767 = vrcp.f32 %v378_v22  ;;  %v393_v27 = vand.u32 2147483648, %v378_v22  ;;  %v391_v29 = vand.u32 2147483647, %v378_v22  ;;  %vm387_vm3 = vweird.f32 %v378_v22 }
 0x1b8   : > { %v394_v32 = vor.u32 1.1754944e-38, %v393_v27  ;;  %vm392_vm5 = vcmp.eq.f32.partialorder %v391_v29, 8.507059e+37 }
 0x1bc   : > { %v768_v23 = vpop.eup %767 }
 0x1bd   : > { %v383_v24 = vmul.f32 %v768_v23, %v378_v22  ;;  %v381_v25 = vpop.xlane.xlu1 %380  ;;  %vm388_vm2 = vweird.f32 %v768_v23 }
 0x1be   : > { %769 = vrcp.f32 %v381_v25  ;;  %vm389_vm4 = vmor %vm387_vm3, %vm388_vm2  ;;  %v407_v38 = vand.u32 2147483648, %v381_v25  ;;  %v405_v40 = vand.u32 2147483647, %v381_v25  ;;  %vm401_vm7 = vweird.f32 %v381_v25 }
 0x1bf   : > { %v384_v26 = vsub.f32 1.0, %v383_v24 }
 0x1c0   : > { %v408_v42 = vor.u32 1.1754944e-38, %v407_v38  ;;  %vm406_vm9 = vcmp.eq.f32.partialorder %v405_v40, 8.507059e+37 }
 0x1c1   : > { %v385_v28 = vmul.f32 %v768_v23, %v384_v26 }
 0x1c3   : > { %v386_v30 = vadd.f32 %v768_v23, %v385_v28 }
 0x1c4   : > { %v770_v31 = vpop.eup %769 }
 0x1c5   : > { %v397_v33 = vmul.f32 %v770_v31, %v381_v25  ;;  %v390_v34 = vsel %vm389_vm4, %v768_v23, %v386_v30  ;;  %vm402_vm6 = vweird.f32 %v770_v31 }
 0x1c6   : > { %v395_v35 = vsel %vm392_vm5, %v394_v32, %v390_v34  ;;  %vm403_vm8 = vmor %vm401_vm7, %vm402_vm6 }
 0x1c7   : > { %v398_v36 = vsub.f32 1.0, %v397_v33  ;;  %v410_v37 = vmul.f32 %v764_v15, %v395_v35 }
 0x1c9   : > { %v399_v39 = vmul.f32 %v770_v31, %v398_v36  ;;  %412 = vst.msk [vmem:[%s296_s23] sm:$0xff] %vm363_vm1, %v410_v37  ;;  %664 = vmatmul.msk.f32.vlgmr.msra.gmra.mxu2 %vm363_vm1, %v410_v37 }
 0x1cb   : > { %v400_v41 = vadd.f32 %v770_v31, %v399_v39 }
 0x1cd   : > { %v404_v43 = vsel %vm403_vm8, %v770_v31, %v400_v41 }
 0x1ce   : > { %v409_v44 = vsel %vm406_vm9, %v408_v42, %v404_v43 }
 0x1cf   : > { %v411_v45 = vmul.f32 %v766_v18, %v409_v44 }
 0x1d1   : > { %413 = vst.msk [vmem:[%s296_s23 + $0x8] sm:$0xff] %vm363_vm1, %v411_v45  ;;  %665 = vmatmul.msk.f32.vlgmr.msra.gmra.mxu3 %vm363_vm1, %v411_v45 }
 0x1d2   : > { %888 = shalt.err (!%p885_p11)
}
 0x1d3   : > { %s985_s23 = smov 128   ;;  %s986_s29 = smov 8  }
 0x1d4   : > { %686 = dma.vmem_to_hbm [thread:$0]  (%p1124_p13), %s500_s26, 256, %s502_s10, %s468_s12, %s985_s23, %s985_s23, %s986_s29  }
 0x1d5   : > { %s289_s5 = scalar_lea.vmem [#allocation8], %s1150_s28  ;;  %s480_s14 = scalar_lea.hbm %s1240_s3, %s1056_s25 }
 0x1d6   : > { %s481_s18 = sshll.u32 %s289_s5, 4  ;;  %s483_s22 = sshll.u32 %s480_s14, 4  ;;  %s482_s18 = int_to_ptr.vmem [resolvable:$true] %s481_s18  ;;  %s484_s22 = int_to_ptr.hbm [resolvable:$true] %s483_s22 }
 0x1d7   : > { %s463_s27 = scalar_lea.sflag [#allocation4], %s1147_s6  ;;  %s903_s11 = sshra.s32 %s484_s22, 4  ;;  %s904_s11 = int_to_ptr.hbm [resolvable:$true] %s903_s11 }
 0x1d8   : > { %s905_s26 = scalar_lea.hbm %s904_s11, 16  ;;  %s909_s12 = scalar_lea.hbm %s1240_s3, 32 }
 0x1d9   : > { %p906_p0 = scmp.ne.s32.totalorder %s904_s11, %s905_s26  ;;  %p910_p2 = scmp.lt.s32.totalorder %s904_s11, %s1240_s3 }
 0x1da   : > { %p911_p3 = scmp.lt.s32.totalorder %s909_s12, %s905_s26 }
 0x1db   : > { %p907_p9 = pnand %p906_p0, %p1124_p13 }
 0x1dc   : > { %p912_p7 = por %p911_p3, %p910_p2 }
 0x1dd   : > { %p908_p1 = pneg %p907_p9 }
 0x1df   : > { %p913_p4 = pnand %p912_p7, %p908_p1 }
 0x24c   : > { %v434_v46 = vpop.f32.mrf.mxu2 }
 0x24d   : > { %460 = vst.msk [vmem:[%s289_s5] sm:$0xff] %vm310_vm0, %v434_v46 }
 0x254   : > { %v457_v47 = vpop.f32.mrf.mxu3 }
 0x255   : > { %461 = vst.msk [vmem:[%s289_s5 + $0x8] sm:$0xff] %vm310_vm0, %v457_v47 }
 0x256   : > { %916 = shalt.err (!%p913_p4)
}
 0x257   : > { %685 = dma.vmem_to_hbm [thread:$0]  (%p1124_p13), %s482_s18, 256, %s484_s22, %s463_s27, %s985_s23, %s985_s23, %s986_s29  }
 0x258 PF: > { %s516_s6 = sand.u32 1, %s959_s15   ;;  %p701_p12 = pnand %p652_p10, %p1051_p5 }
 0x259   : > { %s517_s5 = scalar_lea.sflag [#allocation4], %s516_s6 }
 0x25a   : > { %p702_p6 = pneg %p701_p12 }
 0x25c   : > { %950 = dma.done.wait (%p702_p6), %s517_s5, 256  }
 0x25d   : > { %952 = vsyncadd (%p702_p6), %s517_s5, 4294967040  ;;  %s527_s8 = scalar_lea.sflag [#allocation10], %s516_s6 }
 0x25e   : > { %954 = dma.done.wait (%p702_p6), %s527_s8, 256  }
 0x25f   : > { %956 = vsyncadd (%p702_p6), %s527_s8, 4294967040  ;;  %s25_s20 = sadd.s32 1, %s979_s20   ;;  %s1247_s15 = smov %s963_s16 }
 0x260   : > { %p22_p8 = scmp.ge.s32.totalorder %s25_s20, 4   ;;  %s1248_s16 = smov %s967_s17 }
 0x261   : > { %s1249_s17 = smov %s1134_s9  ;;  %s1250_s18 = smov %s975_s19 }
 0x262   : > { %s1251_s19 = smov %s1253_s30  ;;  %24 = sbr.rel (!%p22_p8) target bundleno = 9 (0x9), region = 104 }
 0x267   :  { %533 = vsyncpa [#allocation3], 1 }
 0x268   :  { %535 = vsyncpa [#allocation3 + $0x1], 1 }
 0x269   :  { %536 = vsyncpa [#allocation6], 1 }
 0x26a   :  { %537 = vsyncpa [#allocation4], 1 }
 0x26b   :  { %539 = vsyncpa [#allocation4 + $0x1], 1 }
 0x26c   :  { %540 = vsyncpa [#allocation10], 1 }
 0x26d   :  { %542 = vsyncpa [#allocation10 + $0x1], 1 }

</bundles_post_ra>
